<compile_context>
chip_gen: v7x
topology: tpu7x:2x2x1
jax: 0.10.0
libtpu: 0.0.40
codegen_flags: <defaults>
</compile_context>

<pallas_src>
import jax
import jax.numpy as jnp
from jax.experimental import pallas as pl
from jax.experimental.pallas import tpu as pltpu

# ---- problem sizes (small, consistent with the module) ---------------------
B = 2            # batch
C_IN = 4         # inp_channels
C_OUT = 16       # out_channels (divisible by n_groups)
K = 5            # kernel_size (odd -> 'same' horizon with padding k//2)
PAD = K // 2
L = 16           # horizon
L_PAD = L + 2 * PAD
G = 8            # n_groups
CPG = C_OUT // G # channels per group
EPS = 1e-5       # torch.nn.GroupNorm default eps
INV_GROUP_N = 1.0 / (CPG * L)


def conv_gn_mish_kernel(x_ref, w_ref, p_ref, pair_ref, o_ref):
    # x_ref:    (B, C_IN, L_PAD)  zero-padded input, all batches at once
    # w_ref:    (K, C_OUT, C_IN)  conv weight, one (C_OUT, C_IN) slab per tap
    # p_ref:    (C_OUT, 3)        packed [bias, gamma, beta]
    # pair_ref: (C_OUT, C_OUT)    pair[c,c'] = 1.0 iff channels c, c' share a group
    # o_ref:    (C_OUT, B*L)      lane-dense output slab (batch merged into lanes)
    bias = p_ref[:, 0:1]
    gamma = p_ref[:, 1:2]
    beta = p_ref[:, 2:3]
    pair = pair_ref[...]

    zs = []
    for b in range(B):                      # B is tiny & static: fully unrolled
        xb = x_ref[b]                       # (C_IN, L_PAD)

        # ---- Conv1d: K accumulating matmuls (no im2col relayout) -----------
        y = jnp.dot(w_ref[0], xb[:, 0:L], preferred_element_type=jnp.float32)
        for k in range(1, K):
            y = y + jnp.dot(w_ref[k], xb[:, k:k + L],
                            preferred_element_type=jnp.float32)
        y = y + bias                        # (C_OUT, L)

        # ---- GroupNorm, two-pass, no (G, CPG*L) reshape ---------------------
        # pair @ y puts each group's channel-sum on every channel row of that
        # group; a lane reduction then yields the group sum broadcast per channel.
        grp_sum = jnp.sum(jnp.dot(pair, y, preferred_element_type=jnp.float32),
                          axis=1, keepdims=True)          # (C_OUT, 1)
        mean = grp_sum * INV_GROUP_N
        yc = y - mean
        grp_ss = jnp.sum(jnp.dot(pair, yc * yc,
                                 preferred_element_type=jnp.float32),
                         axis=1, keepdims=True)
        var = grp_ss * INV_GROUP_N
        scale = gamma * jax.lax.rsqrt(var + EPS)           # fold affine
        zs.append(yc * scale + beta)                       # (C_OUT, L)

    z = jnp.concatenate(zs, axis=1)                        # (C_OUT, B*L), lane-dense

    # ---- Mish: z * tanh(softplus(z)) == z*(e^2+2e)/(e^2+2e+2), e=exp(z) -----
    e = jnp.exp(jnp.minimum(z, 20.0))       # clamp ~ torch softplus threshold
    num = e * (e + 2.0)
    den = num + 2.0
    r = pl.reciprocal(den, approx=True)
    r = r * (2.0 - den * r)                 # one Newton step: near-exact divide
    o_ref[...] = (z * num * r).astype(o_ref.dtype)


def conv1d_block(x, w, b, gamma, beta):
    """x: (B, C_IN, L) f32, w: (C_OUT, C_IN, K) -> (B, C_OUT, L) f32."""
    x_pad = jnp.pad(x, ((0, 0), (0, 0), (PAD, PAD)))       # (B, C_IN, L_PAD)
    w_k = jnp.transpose(w, (2, 0, 1))                       # (K, C_OUT, C_IN)
    params = jnp.stack([b, gamma, beta], axis=1)            # (C_OUT, 3)
    grp_id = jnp.arange(C_OUT) // CPG
    pair = (grp_id[:, None] == grp_id[None, :]).astype(jnp.float32)  # (C_OUT, C_OUT)

    out_slab = pl.pallas_call(
        conv_gn_mish_kernel,
        out_shape=jax.ShapeDtypeStruct((C_OUT, B * L), jnp.float32),
        grid=(1,),                                          # single invocation
        in_specs=[
            pl.BlockSpec((B, C_IN, L_PAD), lambda i: (0, 0, 0)),
            pl.BlockSpec((K, C_OUT, C_IN), lambda i: (0, 0, 0)),
            pl.BlockSpec((C_OUT, 3), lambda i: (0, 0)),
            pl.BlockSpec((C_OUT, C_OUT), lambda i: (0, 0)),
        ],
        out_specs=pl.BlockSpec((C_OUT, B * L), lambda i: (0, 0)),
        compiler_params=pltpu.CompilerParams(
            dimension_semantics=("arbitrary",)),
    )(x_pad, w_k, params, pair)

    # Layout plumbing only (outside the kernel): (C_OUT, B*L) -> (B, C_OUT, L).
    return jnp.transpose(out_slab.reshape(C_OUT, B, L), (1, 0, 2))


def reference(x, w, b, gamma, beta):
    """Pure-JAX reference matching torch Conv1d -> GroupNorm -> Mish."""
    y = jax.lax.conv_general_dilated(
        x, w, window_strides=(1,), padding=[(PAD, PAD)],
        dimension_numbers=("NCH", "OIH", "NCH"),
        precision=jax.lax.Precision.HIGHEST)
    y = y + b[None, :, None]
    yg = y.reshape(B, G, CPG * L)
    mean = yg.mean(axis=2, keepdims=True)
    var = ((yg - mean) ** 2).mean(axis=2, keepdims=True)
    yn = ((yg - mean) / jnp.sqrt(var + EPS)).reshape(B, C_OUT, L)
    z = yn * gamma[None, :, None] + beta[None, :, None]
    return z * jnp.tanh(jax.nn.softplus(z))


if __name__ == "__main__":
    key = jax.random.PRNGKey(0)
    kx, kw, kb, kg, kbt = jax.random.split(key, 5)

    x = jax.random.normal(kx, (B, C_IN, L), dtype=jnp.float32)
    w = jax.random.normal(kw, (C_OUT, C_IN, K), dtype=jnp.float32) * 0.1
    b = jax.random.normal(kb, (C_OUT,), dtype=jnp.float32) * 0.1
    gamma = jnp.ones((C_OUT,), dtype=jnp.float32) + 0.05 * jax.random.normal(
        kg, (C_OUT,), dtype=jnp.float32)
    beta = 0.05 * jax.random.normal(kbt, (C_OUT,), dtype=jnp.float32)

    out = jax.block_until_ready(conv1d_block(x, w, b, gamma, beta))
    ref = jax.block_until_ready(reference(x, w, b, gamma, beta))

    assert out.shape == (B, C_OUT, L)
    # Tolerance accounts for MXU accumulation order and the (Newton-refined)
    # approx reciprocal in the Mish divide; real errors from a wrong kernel
    # would be orders of magnitude larger.
    assert jnp.allclose(out, ref, atol=1e-3, rtol=1e-3), float(
        jnp.max(jnp.abs(out - ref)))

    print("KERNEL_OK")
</pallas_src>

<mosaic_0001>
module attributes {stable_mosaic.version = 11 : i64} {
  func.func @conv_gn_mish_kernel(%arg0: i32, %arg1: memref<2x4x20xf32, #tpu.memory_space<vmem>>, %arg2: memref<5x16x4xf32, #tpu.memory_space<vmem>>, %arg3: memref<16x3xf32, #tpu.memory_space<vmem>>, %arg4: memref<16x16xf32, #tpu.memory_space<vmem>>, %arg5: memref<16x32xf32, #tpu.memory_space<vmem>>) attributes {dimension_semantics = [#tpu.dimension_semantics<arbitrary>], iteration_bounds = array<i64: 1>, scalar_prefetch = 0 : i64, scratch_operands = 0 : i64, tpu.core_type = #tpu.core_type<tc>, window_params = [{pipeline_mode = #tpu.pipeline_mode<synchronous>, transform_indices = @transform_0, window_bounds = array<i64: 2, 4, 20>}, {pipeline_mode = #tpu.pipeline_mode<synchronous>, transform_indices = @transform_1, window_bounds = array<i64: 5, 16, 4>}, {pipeline_mode = #tpu.pipeline_mode<synchronous>, transform_indices = @transform_2, window_bounds = array<i64: 16, 3>}, {pipeline_mode = #tpu.pipeline_mode<synchronous>, transform_indices = @transform_3, window_bounds = array<i64: 16, 16>}, {pipeline_mode = #tpu.pipeline_mode<synchronous>, transform_indices = @transform_4, window_bounds = array<i64: 16, 32>}]} {
    %c0 = arith.constant 0 : index
    %c0_0 = arith.constant 0 : index
    %0 = vector.load %arg3[%c0, %c0_0] : memref<16x3xf32, #tpu.memory_space<vmem>>, vector<16x1xf32>
    %c0_1 = arith.constant 0 : index
    %c1 = arith.constant 1 : index
    %1 = vector.load %arg3[%c0_1, %c1] : memref<16x3xf32, #tpu.memory_space<vmem>>, vector<16x1xf32>
    %c0_2 = arith.constant 0 : index
    %c2 = arith.constant 2 : index
    %2 = vector.load %arg3[%c0_2, %c2] : memref<16x3xf32, #tpu.memory_space<vmem>>, vector<16x1xf32>
    %c0_3 = arith.constant 0 : index
    %c0_4 = arith.constant 0 : index
    %3 = vector.load %arg4[%c0_3, %c0_4] : memref<16x16xf32, #tpu.memory_space<vmem>>, vector<16x16xf32>
    %c0_5 = arith.constant 0 : index
    %c0_6 = arith.constant 0 : index
    %c0_7 = arith.constant 0 : index
    %4 = vector.load %arg1[%c0_5, %c0_6, %c0_7] : memref<2x4x20xf32, #tpu.memory_space<vmem>>, vector<1x4x20xf32>
    %5 = vector.shape_cast %4 : vector<1x4x20xf32> to vector<4x20xf32>
    %c0_8 = arith.constant 0 : index
    %c0_9 = arith.constant 0 : index
    %c0_10 = arith.constant 0 : index
    %6 = vector.load %arg2[%c0_8, %c0_9, %c0_10] : memref<5x16x4xf32, #tpu.memory_space<vmem>>, vector<1x16x4xf32>
    %7 = vector.shape_cast %6 : vector<1x16x4xf32> to vector<16x4xf32>
    %8 = vector.extract_strided_slice %5 {offsets = [0, 0], sizes = [4, 16], strides = [1, 1]} : vector<4x20xf32> to vector<4x16xf32>
    %cst = arith.constant dense<0.000000e+00> : vector<16x16xf32>
    %9 = tpu.matmul %7, %8, %cst {dimension_numbers = #tpu.dot_dimension_numbers<[1], [0], [0], [1], [0, 0, 1, 1], [], []>} : vector<16x4xf32>, vector<4x16xf32>, vector<16x16xf32> -> vector<16x16xf32>
    %c1_11 = arith.constant 1 : index
    %c0_12 = arith.constant 0 : index
    %c0_13 = arith.constant 0 : index
    %10 = vector.load %arg2[%c1_11, %c0_12, %c0_13] : memref<5x16x4xf32, #tpu.memory_space<vmem>>, vector<1x16x4xf32>
    %11 = vector.shape_cast %10 : vector<1x16x4xf32> to vector<16x4xf32>
    %12 = vector.extract_strided_slice %5 {offsets = [0, 1], sizes = [4, 16], strides = [1, 1]} : vector<4x20xf32> to vector<4x16xf32>
    %cst_14 = arith.constant dense<0.000000e+00> : vector<16x16xf32>
    %13 = tpu.matmul %11, %12, %cst_14 {dimension_numbers = #tpu.dot_dimension_numbers<[1], [0], [0], [1], [0, 0, 1, 1], [], []>} : vector<16x4xf32>, vector<4x16xf32>, vector<16x16xf32> -> vector<16x16xf32>
    %14 = arith.addf %9, %13 : vector<16x16xf32>
    %c2_15 = arith.constant 2 : index
    %c0_16 = arith.constant 0 : index
    %c0_17 = arith.constant 0 : index
    %15 = vector.load %arg2[%c2_15, %c0_16, %c0_17] : memref<5x16x4xf32, #tpu.memory_space<vmem>>, vector<1x16x4xf32>
    %16 = vector.shape_cast %15 : vector<1x16x4xf32> to vector<16x4xf32>
    %17 = vector.extract_strided_slice %5 {offsets = [0, 2], sizes = [4, 16], strides = [1, 1]} : vector<4x20xf32> to vector<4x16xf32>
    %cst_18 = arith.constant dense<0.000000e+00> : vector<16x16xf32>
    %18 = tpu.matmul %16, %17, %cst_18 {dimension_numbers = #tpu.dot_dimension_numbers<[1], [0], [0], [1], [0, 0, 1, 1], [], []>} : vector<16x4xf32>, vector<4x16xf32>, vector<16x16xf32> -> vector<16x16xf32>
    %19 = arith.addf %14, %18 : vector<16x16xf32>
    %c3 = arith.constant 3 : index
    %c0_19 = arith.constant 0 : index
    %c0_20 = arith.constant 0 : index
    %20 = vector.load %arg2[%c3, %c0_19, %c0_20] : memref<5x16x4xf32, #tpu.memory_space<vmem>>, vector<1x16x4xf32>
    %21 = vector.shape_cast %20 : vector<1x16x4xf32> to vector<16x4xf32>
    %22 = vector.extract_strided_slice %5 {offsets = [0, 3], sizes = [4, 16], strides = [1, 1]} : vector<4x20xf32> to vector<4x16xf32>
    %cst_21 = arith.constant dense<0.000000e+00> : vector<16x16xf32>
    %23 = tpu.matmul %21, %22, %cst_21 {dimension_numbers = #tpu.dot_dimension_numbers<[1], [0], [0], [1], [0, 0, 1, 1], [], []>} : vector<16x4xf32>, vector<4x16xf32>, vector<16x16xf32> -> vector<16x16xf32>
    %24 = arith.addf %19, %23 : vector<16x16xf32>
    %c4 = arith.constant 4 : index
    %c0_22 = arith.constant 0 : index
    %c0_23 = arith.constant 0 : index
    %25 = vector.load %arg2[%c4, %c0_22, %c0_23] : memref<5x16x4xf32, #tpu.memory_space<vmem>>, vector<1x16x4xf32>
    %26 = vector.shape_cast %25 : vector<1x16x4xf32> to vector<16x4xf32>
    %27 = vector.extract_strided_slice %5 {offsets = [0, 4], sizes = [4, 16], strides = [1, 1]} : vector<4x20xf32> to vector<4x16xf32>
    %cst_24 = arith.constant dense<0.000000e+00> : vector<16x16xf32>
    %28 = tpu.matmul %26, %27, %cst_24 {dimension_numbers = #tpu.dot_dimension_numbers<[1], [0], [0], [1], [0, 0, 1, 1], [], []>} : vector<16x4xf32>, vector<4x16xf32>, vector<16x16xf32> -> vector<16x16xf32>
    %29 = arith.addf %24, %28 : vector<16x16xf32>
    %30 = vector.broadcast %0 : vector<16x1xf32> to vector<16x16xf32>
    %31 = arith.addf %29, %30 : vector<16x16xf32>
    %cst_25 = arith.constant dense<0.000000e+00> : vector<16x16xf32>
    %32 = tpu.matmul %3, %31, %cst_25 {dimension_numbers = #tpu.dot_dimension_numbers<[1], [0], [0], [1], [0, 0, 1, 1], [], []>} : vector<16x16xf32>, vector<16x16xf32>, vector<16x16xf32> -> vector<16x16xf32>
    %cst_26 = arith.constant dense<0.000000e+00> : vector<16xf32>
    %33 = vector.multi_reduction <add>, %32, %cst_26 [1] : vector<16x16xf32> to vector<16xf32>
    %34 = vector.shape_cast %33 : vector<16xf32> to vector<16x1xf32>
    %cst_27 = arith.constant 3.125000e-02 : f32
    %35 = vector.broadcast %cst_27 : f32 to vector<16x1xf32>
    %36 = arith.mulf %34, %35 : vector<16x1xf32>
    %37 = vector.broadcast %36 : vector<16x1xf32> to vector<16x16xf32>
    %38 = arith.subf %31, %37 : vector<16x16xf32>
    %39 = arith.mulf %38, %38 : vector<16x16xf32>
    %cst_28 = arith.constant dense<0.000000e+00> : vector<16x16xf32>
    %40 = tpu.matmul %3, %39, %cst_28 {dimension_numbers = #tpu.dot_dimension_numbers<[1], [0], [0], [1], [0, 0, 1, 1], [], []>} : vector<16x16xf32>, vector<16x16xf32>, vector<16x16xf32> -> vector<16x16xf32>
    %cst_29 = arith.constant dense<0.000000e+00> : vector<16xf32>
    %41 = vector.multi_reduction <add>, %40, %cst_29 [1] : vector<16x16xf32> to vector<16xf32>
    %42 = vector.shape_cast %41 : vector<16xf32> to vector<16x1xf32>
    %cst_30 = arith.constant 3.125000e-02 : f32
    %43 = vector.broadcast %cst_30 : f32 to vector<16x1xf32>
    %44 = arith.mulf %42, %43 : vector<16x1xf32>
    %cst_31 = arith.constant 9.99999974E-6 : f32
    %45 = vector.broadcast %cst_31 : f32 to vector<16x1xf32>
    %46 = arith.addf %44, %45 : vector<16x1xf32>
    %47 = math.rsqrt %46 : vector<16x1xf32>
    %48 = arith.mulf %1, %47 : vector<16x1xf32>
    %49 = vector.broadcast %48 : vector<16x1xf32> to vector<16x16xf32>
    %50 = arith.mulf %38, %49 : vector<16x16xf32>
    %51 = vector.broadcast %2 : vector<16x1xf32> to vector<16x16xf32>
    %52 = arith.addf %50, %51 : vector<16x16xf32>
    %c1_32 = arith.constant 1 : index
    %c0_33 = arith.constant 0 : index
    %c0_34 = arith.constant 0 : index
    %53 = vector.load %arg1[%c1_32, %c0_33, %c0_34] : memref<2x4x20xf32, #tpu.memory_space<vmem>>, vector<1x4x20xf32>
    %54 = vector.shape_cast %53 : vector<1x4x20xf32> to vector<4x20xf32>
    %c0_35 = arith.constant 0 : index
    %c0_36 = arith.constant 0 : index
    %c0_37 = arith.constant 0 : index
    %55 = vector.load %arg2[%c0_35, %c0_36, %c0_37] : memref<5x16x4xf32, #tpu.memory_space<vmem>>, vector<1x16x4xf32>
    %56 = vector.shape_cast %55 : vector<1x16x4xf32> to vector<16x4xf32>
    %57 = vector.extract_strided_slice %54 {offsets = [0, 0], sizes = [4, 16], strides = [1, 1]} : vector<4x20xf32> to vector<4x16xf32>
    %cst_38 = arith.constant dense<0.000000e+00> : vector<16x16xf32>
    %58 = tpu.matmul %56, %57, %cst_38 {dimension_numbers = #tpu.dot_dimension_numbers<[1], [0], [0], [1], [0, 0, 1, 1], [], []>} : vector<16x4xf32>, vector<4x16xf32>, vector<16x16xf32> -> vector<16x16xf32>
    %c1_39 = arith.constant 1 : index
    %c0_40 = arith.constant 0 : index
    %c0_41 = arith.constant 0 : index
    %59 = vector.load %arg2[%c1_39, %c0_40, %c0_41] : memref<5x16x4xf32, #tpu.memory_space<vmem>>, vector<1x16x4xf32>
    %60 = vector.shape_cast %59 : vector<1x16x4xf32> to vector<16x4xf32>
    %61 = vector.extract_strided_slice %54 {offsets = [0, 1], sizes = [4, 16], strides = [1, 1]} : vector<4x20xf32> to vector<4x16xf32>
    %cst_42 = arith.constant dense<0.000000e+00> : vector<16x16xf32>
    %62 = tpu.matmul %60, %61, %cst_42 {dimension_numbers = #tpu.dot_dimension_numbers<[1], [0], [0], [1], [0, 0, 1, 1], [], []>} : vector<16x4xf32>, vector<4x16xf32>, vector<16x16xf32> -> vector<16x16xf32>
    %63 = arith.addf %58, %62 : vector<16x16xf32>
    %c2_43 = arith.constant 2 : index
    %c0_44 = arith.constant 0 : index
    %c0_45 = arith.constant 0 : index
    %64 = vector.load %arg2[%c2_43, %c0_44, %c0_45] : memref<5x16x4xf32, #tpu.memory_space<vmem>>, vector<1x16x4xf32>
    %65 = vector.shape_cast %64 : vector<1x16x4xf32> to vector<16x4xf32>
    %66 = vector.extract_strided_slice %54 {offsets = [0, 2], sizes = [4, 16], strides = [1, 1]} : vector<4x20xf32> to vector<4x16xf32>
    %cst_46 = arith.constant dense<0.000000e+00> : vector<16x16xf32>
    %67 = tpu.matmul %65, %66, %cst_46 {dimension_numbers = #tpu.dot_dimension_numbers<[1], [0], [0], [1], [0, 0, 1, 1], [], []>} : vector<16x4xf32>, vector<4x16xf32>, vector<16x16xf32> -> vector<16x16xf32>
    %68 = arith.addf %63, %67 : vector<16x16xf32>
    %c3_47 = arith.constant 3 : index
    %c0_48 = arith.constant 0 : index
    %c0_49 = arith.constant 0 : index
    %69 = vector.load %arg2[%c3_47, %c0_48, %c0_49] : memref<5x16x4xf32, #tpu.memory_space<vmem>>, vector<1x16x4xf32>
    %70 = vector.shape_cast %69 : vector<1x16x4xf32> to vector<16x4xf32>
    %71 = vector.extract_strided_slice %54 {offsets = [0, 3], sizes = [4, 16], strides = [1, 1]} : vector<4x20xf32> to vector<4x16xf32>
    %cst_50 = arith.constant dense<0.000000e+00> : vector<16x16xf32>
    %72 = tpu.matmul %70, %71, %cst_50 {dimension_numbers = #tpu.dot_dimension_numbers<[1], [0], [0], [1], [0, 0, 1, 1], [], []>} : vector<16x4xf32>, vector<4x16xf32>, vector<16x16xf32> -> vector<16x16xf32>
    %73 = arith.addf %68, %72 : vector<16x16xf32>
    %c4_51 = arith.constant 4 : index
    %c0_52 = arith.constant 0 : index
    %c0_53 = arith.constant 0 : index
    %74 = vector.load %arg2[%c4_51, %c0_52, %c0_53] : memref<5x16x4xf32, #tpu.memory_space<vmem>>, vector<1x16x4xf32>
    %75 = vector.shape_cast %74 : vector<1x16x4xf32> to vector<16x4xf32>
    %76 = vector.extract_strided_slice %54 {offsets = [0, 4], sizes = [4, 16], strides = [1, 1]} : vector<4x20xf32> to vector<4x16xf32>
    %cst_54 = arith.constant dense<0.000000e+00> : vector<16x16xf32>
    %77 = tpu.matmul %75, %76, %cst_54 {dimension_numbers = #tpu.dot_dimension_numbers<[1], [0], [0], [1], [0, 0, 1, 1], [], []>} : vector<16x4xf32>, vector<4x16xf32>, vector<16x16xf32> -> vector<16x16xf32>
    %78 = arith.addf %73, %77 : vector<16x16xf32>
    %79 = vector.broadcast %0 : vector<16x1xf32> to vector<16x16xf32>
    %80 = arith.addf %78, %79 : vector<16x16xf32>
    %cst_55 = arith.constant dense<0.000000e+00> : vector<16x16xf32>
    %81 = tpu.matmul %3, %80, %cst_55 {dimension_numbers = #tpu.dot_dimension_numbers<[1], [0], [0], [1], [0, 0, 1, 1], [], []>} : vector<16x16xf32>, vector<16x16xf32>, vector<16x16xf32> -> vector<16x16xf32>
    %cst_56 = arith.constant dense<0.000000e+00> : vector<16xf32>
    %82 = vector.multi_reduction <add>, %81, %cst_56 [1] : vector<16x16xf32> to vector<16xf32>
    %83 = vector.shape_cast %82 : vector<16xf32> to vector<16x1xf32>
    %cst_57 = arith.constant 3.125000e-02 : f32
    %84 = vector.broadcast %cst_57 : f32 to vector<16x1xf32>
    %85 = arith.mulf %83, %84 : vector<16x1xf32>
    %86 = vector.broadcast %85 : vector<16x1xf32> to vector<16x16xf32>
    %87 = arith.subf %80, %86 : vector<16x16xf32>
    %88 = arith.mulf %87, %87 : vector<16x16xf32>
    %cst_58 = arith.constant dense<0.000000e+00> : vector<16x16xf32>
    %89 = tpu.matmul %3, %88, %cst_58 {dimension_numbers = #tpu.dot_dimension_numbers<[1], [0], [0], [1], [0, 0, 1, 1], [], []>} : vector<16x16xf32>, vector<16x16xf32>, vector<16x16xf32> -> vector<16x16xf32>
    %cst_59 = arith.constant dense<0.000000e+00> : vector<16xf32>
    %90 = vector.multi_reduction <add>, %89, %cst_59 [1] : vector<16x16xf32> to vector<16xf32>
    %91 = vector.shape_cast %90 : vector<16xf32> to vector<16x1xf32>
    %cst_60 = arith.constant 3.125000e-02 : f32
    %92 = vector.broadcast %cst_60 : f32 to vector<16x1xf32>
    %93 = arith.mulf %91, %92 : vector<16x1xf32>
    %cst_61 = arith.constant 9.99999974E-6 : f32
    %94 = vector.broadcast %cst_61 : f32 to vector<16x1xf32>
    %95 = arith.addf %93, %94 : vector<16x1xf32>
    %96 = math.rsqrt %95 : vector<16x1xf32>
    %97 = arith.mulf %1, %96 : vector<16x1xf32>
    %98 = vector.broadcast %97 : vector<16x1xf32> to vector<16x16xf32>
    %99 = arith.mulf %87, %98 : vector<16x16xf32>
    %100 = vector.broadcast %2 : vector<16x1xf32> to vector<16x16xf32>
    %101 = arith.addf %99, %100 : vector<16x16xf32>
    %102 = tpu.concatenate %52, %101 in 1 : vector<16x16xf32>, vector<16x16xf32> -> vector<16x32xf32>
    %cst_62 = arith.constant 2.000000e+01 : f32
    %103 = vector.broadcast %cst_62 : f32 to vector<16x32xf32>
    %104 = arith.minimumf %102, %103 : vector<16x32xf32>
    %105 = math.exp %104 : vector<16x32xf32>
    %cst_63 = arith.constant 2.000000e+00 : f32
    %106 = vector.broadcast %cst_63 : f32 to vector<16x32xf32>
    %107 = arith.addf %105, %106 : vector<16x32xf32>
    %108 = arith.mulf %105, %107 : vector<16x32xf32>
    %cst_64 = arith.constant 2.000000e+00 : f32
    %109 = vector.broadcast %cst_64 : f32 to vector<16x32xf32>
    %110 = arith.addf %108, %109 : vector<16x32xf32>
    %111 = tpu.reciprocal %110 {approx = true} : vector<16x32xf32> -> vector<16x32xf32>
    %112 = arith.mulf %110, %111 : vector<16x32xf32>
    %cst_65 = arith.constant 2.000000e+00 : f32
    %113 = vector.broadcast %cst_65 : f32 to vector<16x32xf32>
    %114 = arith.subf %113, %112 : vector<16x32xf32>
    %115 = arith.mulf %111, %114 : vector<16x32xf32>
    %116 = arith.mulf %102, %108 : vector<16x32xf32>
    %117 = arith.mulf %116, %115 : vector<16x32xf32>
    %c0_66 = arith.constant 0 : index
    %c0_67 = arith.constant 0 : index
    %118 = vector.load %arg5[%c0_66, %c0_67] : memref<16x32xf32, #tpu.memory_space<vmem>>, vector<16x32xf32>
    tpu.vector_store %arg5[%c0_66, %c0_67], %117 {strides = array<i32>} : memref<16x32xf32, #tpu.memory_space<vmem>>, vector<16x32xf32>,
    return
  }
  func.func @transform_0(%arg0: i32) -> (i32, i32, i32) {
    %c0_i32 = arith.constant 0 : i32
    %c0_i32_0 = arith.constant 0 : i32
    %c0_i32_1 = arith.constant 0 : i32
    %c0_i32_2 = arith.constant 0 : i32
    return %c0_i32, %c0_i32_0, %c0_i32_1 : i32, i32, i32
  }
  func.func @transform_1(%arg0: i32) -> (i32, i32, i32) {
    %c0_i32 = arith.constant 0 : i32
    %c0_i32_0 = arith.constant 0 : i32
    %c0_i32_1 = arith.constant 0 : i32
    %c0_i32_2 = arith.constant 0 : i32
    return %c0_i32, %c0_i32_0, %c0_i32_1 : i32, i32, i32
  }
  func.func @transform_2(%arg0: i32) -> (i32, i32) {
    %c0_i32 = arith.constant 0 : i32
    %c0_i32_0 = arith.constant 0 : i32
    %c0_i32_1 = arith.constant 0 : i32
    return %c0_i32, %c0_i32_0 : i32, i32
  }
  func.func @transform_3(%arg0: i32) -> (i32, i32) {
    %c0_i32 = arith.constant 0 : i32
    %c0_i32_0 = arith.constant 0 : i32
    %c0_i32_1 = arith.constant 0 : i32
    return %c0_i32, %c0_i32_0 : i32, i32
  }
  func.func @transform_4(%arg0: i32) -> (i32, i32) {
    %c0_i32 = arith.constant 0 : i32
    %c0_i32_0 = arith.constant 0 : i32
    %c0_i32_1 = arith.constant 0 : i32
    return %c0_i32, %c0_i32_0 : i32, i32
  }
}

</mosaic_0001>

<bundles_post_ra>
// kernel: tpu_custom_call.1
= control target key start
LH: loop header
LB: loop body
LE: loop exit
PB: predicated region body
PF: predicated region fallthrough
CT: control target
= control target key end

     0   :  { %s1593_s19 = smov 127   ;;  %vm31_vm0 = vcmask 31744   ;;  %s1594_s20 = smov 125   ;;  %s1833_s0 = inlined_call_operand.vmem [shape: f32[2,4,20], index: 0, kind: input, shape index: {}]   ;;  %s1834_s1 = inlined_call_operand.vmem [shape: f32[5,16,4], index: 1, kind: input, shape index: {}]   ;;  %s1835_s2 = inlined_call_operand.vmem [shape: f32[16,3], index: 2, kind: input, shape index: {}]   ;;  %s1836_s3 = inlined_call_operand.vmem [shape: f32[16,16], index: 3, kind: input, shape index: {}]   ;;  %s1837_s4 = inlined_call_operand.hbm [shape: f32[16,32], index: 4, kind: output, shape index: {}]  }
   0x1   :  { %v22_v0 = vld [vmem:[%s1833_s0] sm:$0xf]  ;;  %v1635_v1 = vld [vmem:[%s1834_s1 + $0x10] sm:$0xff] }
   0x2   :  { %29 = vrot.lane.b32.xlu0 %v22_v0, %s1593_s19  ;;  %292 = vrot.lane.b32.xlu1 %v22_v0, %s1594_s20 }
   0x3   :  { %1428 = vmatprep.mubr.msk.f32.mxu0 %vm31_vm0, %v1635_v1 }
   0x4   :  { %9 = vsyncpa [#allocation3], 0  ;;  %s1595_s21 = smov 126   ;;  %s1596_s22 = smov 124   ;;  %v1646_v2 = vld [vmem:[%s1835_s2 + $0x8] sm:$0xff]  ;;  %v1651_v3 = vld [vmem:[%s1835_s2] sm:$0xff] }
   0x5   :  { %v1597_v4 = vmov 0   ;;  %vm38_vm1 = vcmask 1043456   ;;  %v1658_v6 = vld [vmem:[%s1834_s1 + $0x18] sm:$0xff]  ;;  %v1664_v7 = vld [vmem:[%s1834_s1] sm:$0xff]  ;;  %v1677_v9 = vld [vmem:[%s1834_s1 + $0x8] sm:$0xff]  ;;  %vm481_vm2 = vcmask 130048  }
   0x6   :  { %202 = vrot.lane.b32.xlu0 %v22_v0, %s1595_s21  ;;  %382 = vrot.lane.b32.xlu1 %v22_v0, %s1596_s22  ;;  %v1682_v10 = vld [vmem:[%s1834_s1 + $0x20] sm:$0xff]  ;;  %v1693_v12 = vld [vmem:[%s1834_s1 + $0x28] sm:$0xff]  ;;  %vm1314_vm3 = vcmask 261120  }
   0x7   :  { %1548 = vset.pattern.permute.xlu1 %v1597_v4  ;;  %1547 = vset.pattern.permute.xlu0 %v1597_v4  ;;  %v1698_v13 = vld [vmem:[%s1834_s1 + $0x30] sm:$0xff]  ;;  %v1709_v15 = vld [vmem:[%s1834_s1 + $0x38] sm:$0xff]  ;;  %v1714_v16 = vld [vmem:[%s1834_s1 + $0x40] sm:$0xff] }
   0x8   :  { %v1724_v17 = vld [vmem:[%s1834_s1 + $0x48] sm:$0xff]  ;;  %v1731_v18 = vld [vmem:[%s1836_s3] sm:$0xff] }
   0x9   :  { %1455 = vmatprep.mubr.msk.f32.mxu1 %vm481_vm2, %v1731_v18  ;;  %v1743_v26 = vld [vmem:[%s1836_s3 + $0x8] sm:$0xff]  ;;  %v1360_v31 = vld [vmem:[%s1833_s0 + $0x4] sm:$0xf]  ;;  %s1600_s0 = smov 16   ;;  %s1601_s3 = smov [#allocation2]  }
   0xa   :  { %476 = vperm.xlu1 %1548, %v1646_v2   ;;  %471 = vperm.xlu0 %1547, %v1651_v3  }
  0x74   :  { %v30_v5 = vpop.permute.xlu0 %29  ;;  %v293_v11 = vpop.permute.xlu1 %292 }
  0x75   :  { %1426 = vmatprep.subr.msk.mxu0 %vm38_vm1, %v30_v5 }
  0x76   :  { %1427 = vmatpush3.msk.msra.mxu0 %vm38_vm1, %v30_v5 }
  0x77   :  { %1429 = vmatmul.mubr.msk.f32.vlgmr.msra.gmra.mrb[0].mxu0 %vm31_vm0, %v1658_v6  ;;  %1431 = vmatprep.subr.msk.mxu0 %vm38_vm1, %v22_v0 }
  0x78   :  { %1432 = vmatpush3.msk.msra.mxu0 %vm38_vm1, %v22_v0  ;;  %v203_v8 = vpop.permute.xlu0 %202  ;;  %1433 = vmatprep.mubr.msk.f32.mxu0 %vm31_vm0, %v1664_v7  ;;  %v383_v14 = vpop.permute.xlu1 %382 }
  0x79   :  { %1436 = vmatprep.subr.msk.mxu0 %vm38_vm1, %v203_v8 }
  0x7f   :  { %1434 = vmatmul.mubr.msk.f32.vlgmr.msra.gmra.mrb[0].mxu0 %vm31_vm0, %v1677_v9 }
  0x80   :  { %1437 = vmatpush3.msk.msra.mxu0 %vm38_vm1, %v203_v8  ;;  %1438 = vmatprep.mubr.msk.f32.mxu0 %vm31_vm0, %v1682_v10 }
  0x81   :  { %1441 = vmatprep.subr.msk.mxu0 %vm38_vm1, %v293_v11 }
  0x87   :  { %1439 = vmatmul.mubr.msk.f32.vlgmr.msra.gmra.mrb[0].mxu0 %vm31_vm0, %v1693_v12 }
  0x88   :  { %1442 = vmatpush3.msk.msra.mxu0 %vm38_vm1, %v293_v11  ;;  %1443 = vmatprep.mubr.msk.f32.mxu0 %vm31_vm0, %v1698_v13 }
  0x89   :  { %1446 = vmatprep.subr.msk.mxu0 %vm38_vm1, %v383_v14  ;;  %v477_v19 = vpop.permute.xlu1 %476  ;;  %v1737_v20 = vpop.permute.xlu0 %471 }
  0x8f   :  { %1444 = vmatmul.mubr.msk.f32.vlgmr.msra.gmra.mrb[0].mxu0 %vm31_vm0, %v1709_v15 }
  0x90   :  { %1447 = vmatpush3.msk.msra.mxu0 %vm38_vm1, %v383_v14  ;;  %1448 = vmatprep.mubr.msk.f32.mxu0 %vm31_vm0, %v1714_v16 }
  0x97   :  { %1449 = vmatmul.mubr.msk.f32.vlgmr.msra.gmra.mrb[0].mxu0 %vm31_vm0, %v1724_v17 }
  0x98   :  { %1494 = vmatprep.mubr.msk.f32.mxu0 %vm481_vm2, %v1731_v18 }
 0x16a   :  { %v1450_v21 = vpop.f32.mrb[0].mxu0 }
 0x16b   :  { %v480_v22 = vadd.f32 %v1450_v21, %v477_v19  ;;  %v458_v23 = vpop.f32.mrb[1].mxu0 }
 0x16c   :  { %v479_v24 = vadd.f32 %v1737_v20, %v458_v23 }
 0x16e   :  { %v1504_v25 = vpack.c.bf16 %v480_v22, %v479_v24 }
 0x170   :  { %1505 = vmatprep.subr.bf16.mxu1 %v1504_v25 }
 0x171   :  { %1507 = vmatpush3.bf16.msra.mxu1 %v1504_v25 }
 0x174   :  { %1456 = vmatmul.mubr.msk.f32.vlgmr.msra.gmra.mrb[0].mxu1 %vm481_vm2, %v1743_v26 }
 0x175   :  { %1462 = vmatprep.mubr.msk.f32.mxu1 %vm481_vm2, %v1731_v18 }
 0x247   :  { %v1457_v27 = vpop.f32.mrb[0].mxu1 }
 0x248   :  { %v554_v28 = vpop.f32.mrb[1].mxu1  ;;  %v566_v29 = vsel %vm481_vm2, %v1457_v27, 0.0 }
 0x249   :  { %567 = vadd.xlane.f32.xlu0 %v566_v29  ;;  %v563_v30 = vsel %vm481_vm2, %v554_v28, 0.0 }
 0x24a   :  { %564 = vadd.xlane.f32.xlu1 %v563_v30 }
 0x25b   :  { %845 = vrot.lane.b32.xlu1 %v1360_v31, %s1595_s21 }
 0x25f   :  { %689 = vrot.lane.b32.xlu0 %v1360_v31, %s1593_s19  ;;  %926 = vrot.lane.b32.xlu1 %v1360_v31, %s1594_s20  ;;  %s1322_s19 = sshll.u32 %s1601_s3, 4  ;;  %s1323_s19 = int_to_ptr.vmem [resolvable:$true] %s1322_s19 }
 0x260   :  { %s1569_s20 = scalar_lea.vmem %s1323_s19, 256  ;;  %p1574_p1 = scmp.lt.s32.totalorder %s1323_s19, %s1323_s19 }
 0x261   :  { %p1570_p0 = scmp.ne.s32.totalorder %s1323_s19, %s1569_s20  ;;  %p1575_p2 = scmp.lt.s32.totalorder %s1569_s20, %s1569_s20 }
 0x263   :  { %1007 = vrot.lane.b32.xlu0 %v1360_v31, %s1596_s22  ;;  %p1576_p3 = por %p1575_p2, %p1574_p1 }
 0x265   :  { %p1577_p4 = pnand %p1576_p3, %p1570_p0 }
 0x2d6   :  { %v568_v32 = vpop.xlane.xlu0 %567 }
 0x2d7   :  { %v570_v33 = vmul.f32 0.03125, %v568_v32  ;;  %v565_v34 = vpop.xlane.xlu1 %564 }
 0x2d8   :  { %v569_v35 = vmul.f32 0.03125, %v565_v34 }
 0x2d9   :  { %v1758_v36 = vsub.f32 %v480_v22, %v570_v33 }
 0x2da   :  { %v1760_v37 = vsub.f32 %v479_v24, %v569_v35  ;;  %v690_v41 = vpop.permute.xlu0 %689 }
 0x2db   :  { %v574_v38 = vmul.f32 %v1758_v36, %v1758_v36  ;;  %v846_v42 = vpop.permute.xlu1 %845 }
 0x2dc   :  { %v573_v39 = vmul.f32 %v1760_v37, %v1760_v37 }
 0x2de   :  { %v1508_v40 = vpack.c.bf16 %v574_v38, %v573_v39  ;;  %v1008_v44 = vpop.permute.xlu0 %1007 }
 0x2df   :  { %v927_v43 = vpop.permute.xlu1 %926 }
 0x2e0   :  { %1509 = vmatprep.subr.bf16.mxu1 %v1508_v40 }
 0x2e1   :  { %1511 = vmatpush3.bf16.msra.mxu1 %v1508_v40 }
 0x2e2   :  { %1465 = vmatprep.subr.msk.mxu1 %vm38_vm1, %v690_v41 }
 0x2e4   :  { %1463 = vmatmul.mubr.msk.f32.vlgmr.msra.gmra.mrb[2].mxu1 %vm481_vm2, %v1743_v26 }
 0x2e5   :  { %1466 = vmatpush3.msk.msra.mxu1 %vm38_vm1, %v690_v41  ;;  %1467 = vmatprep.mubr.msk.f32.mxu1 %vm31_vm0, %v1635_v1 }
 0x2e6   :  { %1470 = vmatprep.subr.msk.mxu1 %vm38_vm1, %v1360_v31 }
 0x2e8   :  { %1468 = vmatmul.mubr.msk.f32.vlgmr.msra.gmra.mrb[4].mxu1 %vm31_vm0, %v1658_v6 }
 0x2e9   :  { %1471 = vmatpush3.msk.msra.mxu1 %vm38_vm1, %v1360_v31  ;;  %1472 = vmatprep.mubr.msk.f32.mxu1 %vm31_vm0, %v1664_v7 }
 0x2ea   :  { %1475 = vmatprep.subr.msk.mxu1 %vm38_vm1, %v846_v42 }
 0x2f0   :  { %1473 = vmatmul.mubr.msk.f32.vlgmr.msra.gmra.mrb[4].mxu1 %vm31_vm0, %v1677_v9  ;;  %v1598_v9 = vmov 1  }
 0x2f1   :  { %1476 = vmatpush3.msk.msra.mxu1 %vm38_vm1, %v846_v42  ;;  %1477 = vmatprep.mubr.msk.f32.mxu1 %vm31_vm0, %v1682_v10 }
 0x2f2   :  { %1480 = vmatprep.subr.msk.mxu1 %vm38_vm1, %v927_v43  ;;  %1550 = vset.pattern.permute.xlu1 %v1598_v9 }
 0x2f3   :  { %1549 = vset.pattern.permute.xlu0 %v1598_v9 }
 0x2f8   :  { %1478 = vmatmul.mubr.msk.f32.vlgmr.msra.gmra.mrb[4].mxu1 %vm31_vm0, %v1693_v12 }
 0x2f9   :  { %1481 = vmatpush3.msk.msra.mxu1 %vm38_vm1, %v927_v43  ;;  %1482 = vmatprep.mubr.msk.f32.mxu1 %vm31_vm0, %v1698_v13 }
 0x2fa   :  { %1485 = vmatprep.subr.msk.mxu1 %vm38_vm1, %v1008_v44 }
 0x300   :  { %1483 = vmatmul.mubr.msk.f32.vlgmr.msra.gmra.mrb[4].mxu1 %vm31_vm0, %v1709_v15 }
 0x301   :  { %1486 = vmatpush3.msk.msra.mxu1 %vm38_vm1, %v1008_v44  ;;  %1487 = vmatprep.mubr.msk.f32.mxu1 %vm31_vm0, %v1714_v16 }
 0x308   :  { %1488 = vmatmul.mubr.msk.f32.vlgmr.msra.gmra.mrb[4].mxu1 %vm31_vm0, %v1724_v17 }
 0x3b7   :  { %v1464_v45 = vpop.f32.mrb[2].mxu1 }
 0x3b8   :  { %v641_v46 = vpop.f32.mrb[3].mxu1  ;;  %v653_v7 = vsel %vm481_vm2, %v1464_v45, 0.0 }
 0x3b9   :  { %v650_v8 = vsel %vm481_vm2, %v641_v46, 0.0 }
 0x3db   :  { %v1489_v47 = vpop.f32.mrb[4].mxu1 }
 0x3dc   :  { %v1089_v48 = vadd.f32 %v1489_v47, %v477_v19  ;;  %v1077_v49 = vpop.f32.mrb[5].mxu1 }
 0x3dd   :  { %v1088_v50 = vadd.f32 %v1077_v49, %v1737_v20 }
 0x3df   :  { %v1512_v51 = vpack.c.bf16 %v1089_v48, %v1088_v50 }
 0x3e1   :  { %1513 = vmatprep.subr.bf16.mxu0 %v1512_v51 }
 0x3e2   :  { %1515 = vmatpush3.bf16.msra.mxu0 %v1512_v51 }
 0x3e5   :  { %1495 = vmatmul.mubr.msk.f32.vlgmr.msra.gmra.mrb[2].mxu0 %vm481_vm2, %v1743_v26 }
 0x3e6   :  { %1501 = vmatprep.mubr.msk.f32.mxu0 %vm481_vm2, %v1731_v18 }
 0x4b8   :  { %v1496_v52 = vpop.f32.mrb[2].mxu0 }
 0x4b9   :  { %v1156_v53 = vpop.f32.mrb[3].mxu0  ;;  %v1168_v54 = vsel %vm481_vm2, %v1496_v52, 0.0 }
 0x4ba   :  { %1169 = vadd.xlane.f32.xlu0 %v1168_v54  ;;  %v1165_v55 = vsel %vm481_vm2, %v1156_v53, 0.0 }
 0x4bb   :  { %1166 = vadd.xlane.f32.xlu1 %v1165_v55 }
 0x547   :  { %v1170_v56 = vpop.xlane.xlu0 %1169 }
 0x548   :  { %v1172_v57 = vmul.f32 0.03125, %v1170_v56  ;;  %v1167_v58 = vpop.xlane.xlu1 %1166 }
 0x549   :  { %v1171_v59 = vmul.f32 0.03125, %v1167_v58 }
 0x54a   :  { %v1174_v60 = vsub.f32 %v1089_v48, %v1172_v57 }
 0x54b   :  { %v1173_v61 = vsub.f32 %v1088_v50, %v1171_v59 }
 0x54c   :  { %v1176_v62 = vmul.f32 %v1174_v60, %v1174_v60 }
 0x54d   :  { %v1175_v63 = vmul.f32 %v1173_v61, %v1173_v61 }
 0x54f   :  { %v1516_v0 = vpack.c.bf16 %v1176_v62, %v1175_v63 }
 0x551   :  { %1517 = vmatprep.subr.bf16.mxu0 %v1516_v0 }
 0x552   :  { %1519 = vmatpush3.bf16.msra.mxu0 %v1516_v0 }
 0x555   :  { %1502 = vmatmul.mubr.msk.f32.vlgmr.msra.gmra.mrb[4].mxu0 %vm481_vm2, %v1743_v26  ;;  %v1599_v26 = vmov 2  }
 0x628   :  { %v1503_v1 = vpop.f32.mrb[4].mxu0 }
 0x629   :  { %v1243_v4 = vpop.f32.mrb[5].mxu0  ;;  %v1255_v5 = vsel %vm481_vm2, %v1503_v1, 0.0 }
 0x62a   :  { %1256 = vadd.xlane.f32.xlu1 %v1255_v5  ;;  %v1252_v6 = vsel %vm481_vm2, %v1243_v4, 0.0 }
 0x62b   :  { %1253 = vadd.xlane.f32.xlu0 %v1252_v6 }
 0x62e   :  { %654 = vadd.xlane.f32.xlu1 %v653_v7 }
 0x62f   :  { %651 = vadd.xlane.f32.xlu0 %v650_v8 }
 0x6b7   :  { %v1257_v10 = vpop.xlane.xlu1 %1256 }
 0x6b8   :  { %v1259_v11 = vmul.f32 0.03125, %v1257_v10  ;;  %v1254_v12 = vpop.xlane.xlu0 %1253 }
 0x6b9   :  { %v1258_v13 = vmul.f32 0.03125, %v1254_v12 }
 0x6ba   :  { %v1261_v14 = vadd.f32 1e-05, %v1259_v11 }
 0x6bb   :  { %v1260_v15 = vadd.f32 1e-05, %v1258_v13  ;;  %v655_v18 = vpop.xlane.xlu1 %654 }
 0x6bc   :  { %1553 = vrsqrt.f32 %v1261_v14  ;;  %v652_v16 = vpop.xlane.xlu0 %651  ;;  %v657_v19 = vmul.f32 0.03125, %v655_v18 }
 0x6bd   :  { %1555 = vrsqrt.f32 %v1260_v15  ;;  %v656_v17 = vmul.f32 0.03125, %v652_v16 }
 0x6be   :  { %v659_v24 = vadd.f32 1e-05, %v657_v19 }
 0x6bf   :  { %v658_v20 = vadd.f32 1e-05, %v656_v17 }
 0x6c1   :  { %1557 = vrsqrt.f32 %v658_v20 }
 0x6c2   :  { %1559 = vrsqrt.f32 %v659_v24 }
 0x6c6   :  { %v1554_v21 = vpop.eup %1553 }
 0x6c7   :  { %v1556_v22 = vpop.eup %1555  ;;  %v1265_v23 = vmul.f32 %v1554_v21, %v1646_v2 }
 0x6c8   :  { %v1264_v25 = vmul.f32 %v1556_v22, %v1651_v3 }
 0x6c9   :  { %1273 = vperm.xlu1 %1550, %v1265_v23  }
 0x6ca   :  { %1268 = vperm.xlu0 %1549, %v1264_v25  }
 0x6cb   :  { %v1558_v27 = vpop.eup %1557 }
 0x6cc   :  { %v662_v28 = vmul.f32 %v1558_v27, %v1651_v3  ;;  %v1560_v29 = vpop.eup %1559 }
 0x6cd   :  { %1551 = vset.pattern.permute.xlu1 %v1599_v26  ;;  %v663_v30 = vmul.f32 %v1560_v29, %v1646_v2 }
 0x6ce   :  { %677 = vperm.xlu1 %1551, %v1651_v3  }
 0x6d2   :  { %681 = vperm.xlu1 %1551, %v1646_v2  }
 0x6d6   :  { %1552 = vset.pattern.permute.xlu1 %v1598_v9 }
 0x6d7   :  { %666 = vperm.xlu1 %1552, %v662_v28  }
 0x6db   :  { %671 = vperm.xlu1 %1552, %v663_v30  }
 0x748   :  { %v1274_v31 = vpop.permute.xlu1 %1273 }
 0x749   :  { %v1269_v32 = vpop.permute.xlu0 %1268  ;;  %v1277_v38 = vmul.f32 %v1274_v31, %v1174_v60 }
 0x74a   :  { %v1276_v33 = vmul.f32 %v1269_v32, %v1173_v61 }
 0x74d   :  { %v678_v34 = vpop.permute.xlu1 %677 }
 0x74e   :  { %v1278_v35 = vadd.f32 %v1276_v33, %v678_v34 }
 0x750   :  { %1282 = vrot.lane.b32.xlu1 %v1278_v35, %s1600_s0 }
 0x751   :  { %v682_v39 = vpop.permute.xlu1 %681 }
 0x752   :  { %v1279_v40 = vadd.f32 %v1277_v38, %v682_v39 }
 0x754   :  { %1284 = vrot.lane.b32.xlu1 %v1279_v40, %s1600_s0 }
 0x756   :  { %v667_v41 = vpop.permute.xlu1 %666 }
 0x757   :  { %v674_v3 = vmul.f32 %v667_v41, %v1760_v37 }
 0x759   :  { %v684_v43 = vadd.f32 %v678_v34, %v674_v3 }
 0x75a   :  { %v672_v42 = vpop.permute.xlu1 %671 }
 0x75b   :  { %v675_v44 = vmul.f32 %v672_v42, %v1758_v36 }
 0x75d   :  { %v685_v47 = vadd.f32 %v682_v39, %v675_v44 }
 0x7c2   :  { %v1283_v2 = vpop.permute.xlu1 %1282 }
 0x7c3   :  { %v1288_v45 = vsel %vm481_vm2, %v684_v43, %v1283_v2 }
 0x7c4   :  { %v1290_v46 = vmin.f32 %v1288_v45, 20.0 }
 0x7c6   :  { %v1292_v48 = vmul.f32 1.442695, %v1290_v46  ;;  %v1285_v49 = vpop.permute.xlu1 %1284 }
 0x7c7   :  { %v1289_v50 = vsel %vm481_vm2, %v685_v47, %v1285_v49 }
 0x7c8   :  { %1561 = vpow2.f32 %v1292_v48  ;;  %v1291_v51 = vmin.f32 %v1289_v50, 20.0 }
 0x7ca   :  { %v1294_v52 = vmul.f32 1.442695, %v1291_v51 }
 0x7cc   :  { %1563 = vpow2.f32 %v1294_v52 }
 0x7d2   :  { %v1562_v53 = vpop.eup %1561 }
 0x7d3   :  { %v1296_v54 = vadd.f32 2.0, %v1562_v53 }
 0x7d5   :  { %v1298_v37 = vmul.f32 %v1562_v53, %v1296_v54 }
 0x7d6   :  { %v1564_v55 = vpop.eup %1563 }
 0x7d7   :  { %v1300_v56 = vadd.f32 2.0, %v1298_v37  ;;  %v1297_v57 = vadd.f32 2.0, %v1564_v55  ;;  %v1310_v0 = vmul.f32 %v1298_v37, %v1288_v45 }
 0x7d9   :  { %1565 = vrcp.f32 %v1300_v56  ;;  %v1299_v36 = vmul.f32 %v1564_v55, %v1297_v57 }
 0x7db   :  { %v1301_v58 = vadd.f32 2.0, %v1299_v36  ;;  %v1311_v7 = vmul.f32 %v1299_v36, %v1289_v50 }
 0x7dd   :  { %1567 = vrcp.f32 %v1301_v58 }
 0x7e3   :  { %v1566_v59 = vpop.eup %1565 }
 0x7e4   :  { %v1304_v60 = vmul.f32 %v1566_v59, %v1300_v56 }
 0x7e6   :  { %v1306_v61 = vsub.f32 2.0, %v1304_v60 }
 0x7e7   :  { %v1568_v62 = vpop.eup %1567 }
 0x7e8   :  { %v1308_v63 = vmul.f32 %v1566_v59, %v1306_v61  ;;  %v1305_v1 = vmul.f32 %v1568_v62, %v1301_v58 }
 0x7ea   :  { %v1312_v4 = vmul.f32 %v1310_v0, %v1308_v63  ;;  %v1307_v5 = vsub.f32 2.0, %v1305_v1 }
 0x7ec   :  { %1315 = vst.msk [vmem:[#allocation2] sm:$0xff] %vm1314_vm3, %v1312_v4  ;;  %v1309_v6 = vmul.f32 %v1568_v62, %v1307_v5 }
 0x7ee   :  { %v1313_v8 = vmul.f32 %v1311_v7, %v1309_v6 }
 0x7f0   :  { %1316 = vst.msk [vmem:[#allocation2 + $0x8] sm:$0xff] %vm1314_vm3, %v1313_v8 }
 0x7f1   :  { %1580 = shalt.err (!%p1577_p4)
}
 0x7f2   :  { %s1581_s27 = scalar_lea.hbm %s1837_s4, 256 }
 0x7f3   :  { %p1582_p5 = scmp.ne.s32.totalorder %s1837_s4, %s1581_s27  ;;  %p1585_p6 = scmp.lt.u32.totalorder %s1581_s27, %s1837_s4 }
 0x7f5   :  { %p1587_p7 = pnand %p1585_p6, %p1582_p5 }
 0x7f7   :  { %1590 = shalt.err (!%p1587_p7)
}
 0x7f8   :  { %s1602_s5 = smov 128   ;;  %s1603_s6 = smov 8  }
 0x7f9   :  { %1328 = dma.vmem_to_hbm [thread:$0]  %s1323_s19, 256, %s1837_s4, [#allocation3], %s1602_s5, %s1602_s5, %s1603_s6  }
 0x7fa   :  { %1591 = dma.done.wait [#allocation3], 256  }
 0x7fb   :  { %1592 = vsyncadd [#allocation3], 4294967040 }
 0x7fc   :  { %1332 = vsyncpa [#allocation3], 1 }

</bundles_post_ra>
